<compile_context>
chip_gen: v6e
topology: v6e:2x2x1
jax: 0.10.0
libtpu: 0.0.40
codegen_flags: <defaults>
</compile_context>

<pallas_src>
import jax
import jax.numpy as jnp
from jax.experimental import pallas as pl
from jax.experimental.pallas import tpu as pltpu

HID = 64  # hidden width of both Linear(·, 64) layers


def _g_mlp_kernel(z_ref, s_ref, w1z_ref, w1s_ref, b1_ref,
                  w2_ref, b2_ref, w3_ref, b3_ref, o_ref):
    """Transposed 3-layer MLP.  Features on sublanes, batch on the 128 lanes.

    z_ref : (L, TB)    s_ref : (1, TB)    o_ref : (1, TB)
    w1z   : (64, L)    w1s   : (64, 1)    b1    : (64, 1)
    w2    : (64, 64)   b2    : (64, 1)
    w3    : (1, 64)    b3    : (1, 1)
    """
    zt = z_ref[...]
    st = s_ref[...]
    # Layer 1: cat([z, s]) @ W1 expressed without the concat buffer:
    #   W1zᵀ·zᵀ + w1sᵀ ⊗ sᵀ + b1ᵀ            -> (64, TB)
    h1 = jnp.dot(w1z_ref[...], zt, preferred_element_type=jnp.float32)
    h1 = h1 + w1s_ref[...] * st + b1_ref[...]
    h1 = jnp.maximum(h1, 0.0)                                    # ReLU
    # Layer 2
    h2 = jnp.dot(w2_ref[...], h1, preferred_element_type=jnp.float32) + b2_ref[...]
    h2 = jnp.maximum(h2, 0.0)                                    # ReLU
    # Layer 3 -> lane-dense (1, TB) slab
    o_ref[...] = jnp.dot(w3_ref[...], h2,
                         preferred_element_type=jnp.float32) + b3_ref[...]


def _round_up(x, m):
    return (x + m - 1) // m * m


def g_forward(s, params, z_key, *, tile_b=512):
    """Mirror of G.forward(s).  s: (batch, 1) f32 -> (batch, 1) f32."""
    batch = s.shape[0]
    L = params["w1"].shape[0] - 1

    # Lane-aligned batch tile; pad batch to a multiple of it (sweep 512-2048).
    tile_b = max(128, min(tile_b, _round_up(batch, 128)))
    batch_p = _round_up(batch, tile_b)
    grid = (batch_p // tile_b,)

    # z is sampled directly in the transposed (L, batch_p) layout: i.i.d. N(0,1),
    # distributionally identical to sampling (batch, L) and transposing.
    zT = jax.random.normal(z_key, (L, batch_p), dtype=jnp.float32)
    sT = jnp.pad(s.astype(jnp.float32).reshape(1, batch),
                 ((0, 0), (0, batch_p - batch)))

    # One-off (tiny) weight transposes so features sit on sublanes.
    w1, b1 = params["w1"], params["b1"]          # (L+1,64), (1,64)
    w1z_t = w1[:L, :].T                          # (64, L)
    w1s_t = w1[L:, :].T                          # (64, 1)
    b1_t = b1.reshape(HID, 1)                    # (64, 1)
    w2_t = params["w2"].T                        # (64, 64)
    b2_t = params["b2"].reshape(HID, 1)          # (64, 1)
    w3_t = params["w3"].T                        # (1, 64)
    b3_t = params["b3"].reshape(1, 1)            # (1, 1)

    # Weights/biases: constant block index -> stay VMEM-resident across grid.
    resident = lambda shp: pl.BlockSpec(shp, lambda i: (0,) * len(shp))

    flops = 2 * batch_p * (L * HID + HID * HID + HID * 1)
    bytes_accessed = 4 * (L * batch_p + 2 * batch_p
                          + w1z_t.size + w1s_t.size + b1_t.size
                          + w2_t.size + b2_t.size + w3_t.size + b3_t.size)

    outT = pl.pallas_call(
        _g_mlp_kernel,
        out_shape=jax.ShapeDtypeStruct((1, batch_p), jnp.float32),
        grid=grid,
        in_specs=[
            pl.BlockSpec((L, tile_b), lambda i: (0, i)),     # zT tile
            pl.BlockSpec((1, tile_b), lambda i: (0, i)),     # sT tile
            resident(w1z_t.shape), resident(w1s_t.shape), resident(b1_t.shape),
            resident(w2_t.shape), resident(b2_t.shape),
            resident(w3_t.shape), resident(b3_t.shape),
        ],
        out_specs=pl.BlockSpec((1, tile_b), lambda i: (0, i)),
        compiler_params=pltpu.CompilerParams(
            dimension_semantics=("parallel",)),              # v7x: 2 TCs share batch
        cost_estimate=pl.CostEstimate(
            flops=flops, transcendentals=0, bytes_accessed=bytes_accessed),
    )(zT, sT, w1z_t, w1s_t, b1_t, w2_t, b2_t, w3_t, b3_t)

    # Layout plumbing only: lane-dense (1, batch_p) slab -> (batch, 1).
    return outT[0, :batch].reshape(batch, 1)


def init_g_params(key, latent_size):
    """Deterministic init matching the nn.Linear shapes (Kaiming-uniform-ish)."""
    in_dim = latent_size + 1
    k1, k2, k3, k4, k5, k6 = jax.random.split(key, 6)

    def lin(kw, kb, fan_in, fan_out):
        bound = 1.0 / jnp.sqrt(jnp.float32(fan_in))
        w = jax.random.uniform(kw, (fan_in, fan_out), jnp.float32, -bound, bound)
        b = jax.random.uniform(kb, (1, fan_out), jnp.float32, -bound, bound)
        return w, b

    w1, b1 = lin(k1, k2, in_dim, 64)
    w2, b2 = lin(k3, k4, 64, 64)
    w3, b3 = lin(k5, k6, 64, 1)
    return {"w1": w1, "b1": b1, "w2": w2, "b2": b2, "w3": w3, "b3": b3}


def _g_forward_ref(s, params, z_key, *, tile_b=512):
    """Pure-JAX reference using the SAME z stream as g_forward (for checking)."""
    batch = s.shape[0]
    L = params["w1"].shape[0] - 1
    tile_b = max(128, min(tile_b, _round_up(batch, 128)))
    batch_p = _round_up(batch, tile_b)
    zT = jax.random.normal(z_key, (L, batch_p), dtype=jnp.float32)
    z = zT[:, :batch].T                                          # (batch, L)
    inp = jnp.concatenate([z, s.astype(jnp.float32)], axis=-1)   # (batch, L+1)
    h1 = jnp.maximum(inp @ params["w1"] + params["b1"], 0.0)
    h2 = jnp.maximum(h1 @ params["w2"] + params["b2"], 0.0)
    return h2 @ params["w3"] + params["b3"]


if __name__ == "__main__":
    latent_size = 15          # -> MLP input dim = 16
    batch = 8

    root = jax.random.PRNGKey(0)
    k_param, k_s, k_z = jax.random.split(root, 3)

    params = init_g_params(k_param, latent_size)
    s = jax.random.normal(k_s, (batch, 1), dtype=jnp.float32)   # conditioning scalar/row

    out = g_forward(s, params, k_z)
    out = jax.block_until_ready(out)

    assert out.shape == (batch, 1) and out.dtype == jnp.float32

    ref = jax.block_until_ready(_g_forward_ref(s, params, k_z))
    assert jnp.allclose(out, ref, atol=2e-2, rtol=2e-2), (out, ref)

    print("KERNEL_OK")
</pallas_src>

<mosaic_0001>
module attributes {stable_mosaic.version = 11 : i64} {
  func.func @_g_mlp_kernel(%arg0: i32, %arg1: memref<15x128xf32, #tpu.memory_space<vmem>>, %arg2: memref<1x128xf32, #tpu.memory_space<vmem>>, %arg3: memref<64x15xf32, #tpu.memory_space<vmem>>, %arg4: memref<64x1xf32, #tpu.memory_space<vmem>>, %arg5: memref<64x1xf32, #tpu.memory_space<vmem>>, %arg6: memref<64x64xf32, #tpu.memory_space<vmem>>, %arg7: memref<64x1xf32, #tpu.memory_space<vmem>>, %arg8: memref<1x64xf32, #tpu.memory_space<vmem>>, %arg9: memref<1x1xf32, #tpu.memory_space<vmem>>, %arg10: memref<1x128xf32, #tpu.memory_space<vmem>>) attributes {dimension_semantics = [#tpu.dimension_semantics<parallel>], iteration_bounds = array<i64: 1>, scalar_prefetch = 0 : i64, scratch_operands = 0 : i64, tpu.core_type = #tpu.core_type<tc>, window_params = [{transform_indices = @transform_0, window_bounds = array<i64: 15, 128>}, {transform_indices = @transform_1, window_bounds = array<i64: 1, 128>}, {pipeline_mode = #tpu.pipeline_mode<synchronous>, transform_indices = @transform_2, window_bounds = array<i64: 64, 15>}, {pipeline_mode = #tpu.pipeline_mode<synchronous>, transform_indices = @transform_3, window_bounds = array<i64: 64, 1>}, {pipeline_mode = #tpu.pipeline_mode<synchronous>, transform_indices = @transform_4, window_bounds = array<i64: 64, 1>}, {pipeline_mode = #tpu.pipeline_mode<synchronous>, transform_indices = @transform_5, window_bounds = array<i64: 64, 64>}, {pipeline_mode = #tpu.pipeline_mode<synchronous>, transform_indices = @transform_6, window_bounds = array<i64: 64, 1>}, {pipeline_mode = #tpu.pipeline_mode<synchronous>, transform_indices = @transform_7, window_bounds = array<i64: 1, 64>}, {pipeline_mode = #tpu.pipeline_mode<synchronous>, transform_indices = @transform_8, window_bounds = array<i64: 1, 1>}, {transform_indices = @transform_9, window_bounds = array<i64: 1, 128>}]} {
    %c0 = arith.constant 0 : index
    %c0_0 = arith.constant 0 : index
    %0 = vector.load %arg1[%c0, %c0_0] : memref<15x128xf32, #tpu.memory_space<vmem>>, vector<15x128xf32>
    %c0_1 = arith.constant 0 : index
    %c0_2 = arith.constant 0 : index
    %1 = vector.load %arg2[%c0_1, %c0_2] : memref<1x128xf32, #tpu.memory_space<vmem>>, vector<1x128xf32>
    %c0_3 = arith.constant 0 : index
    %c0_4 = arith.constant 0 : index
    %2 = vector.load %arg3[%c0_3, %c0_4] : memref<64x15xf32, #tpu.memory_space<vmem>>, vector<64x15xf32>
    %cst = arith.constant dense<0.000000e+00> : vector<64x128xf32>
    %3 = tpu.matmul %2, %0, %cst {dimension_numbers = #tpu.dot_dimension_numbers<[1], [0], [0], [1], [0, 0, 1, 1], [], []>} : vector<64x15xf32>, vector<15x128xf32>, vector<64x128xf32> -> vector<64x128xf32>
    %c0_5 = arith.constant 0 : index
    %c0_6 = arith.constant 0 : index
    %4 = vector.load %arg4[%c0_5, %c0_6] : memref<64x1xf32, #tpu.memory_space<vmem>>, vector<64x1xf32>
    %5 = vector.broadcast %4 : vector<64x1xf32> to vector<64x128xf32>
    %6 = vector.broadcast %1 : vector<1x128xf32> to vector<64x128xf32>
    %7 = arith.mulf %5, %6 : vector<64x128xf32>
    %8 = arith.addf %3, %7 : vector<64x128xf32>
    %c0_7 = arith.constant 0 : index
    %c0_8 = arith.constant 0 : index
    %9 = vector.load %arg5[%c0_7, %c0_8] : memref<64x1xf32, #tpu.memory_space<vmem>>, vector<64x1xf32>
    %10 = vector.broadcast %9 : vector<64x1xf32> to vector<64x128xf32>
    %11 = arith.addf %8, %10 : vector<64x128xf32>
    %cst_9 = arith.constant 0.000000e+00 : f32
    %12 = vector.broadcast %cst_9 : f32 to vector<64x128xf32>
    %13 = arith.maximumf %11, %12 : vector<64x128xf32>
    %c0_10 = arith.constant 0 : index
    %c0_11 = arith.constant 0 : index
    %14 = vector.load %arg6[%c0_10, %c0_11] : memref<64x64xf32, #tpu.memory_space<vmem>>, vector<64x64xf32>
    %cst_12 = arith.constant dense<0.000000e+00> : vector<64x128xf32>
    %15 = tpu.matmul %14, %13, %cst_12 {dimension_numbers = #tpu.dot_dimension_numbers<[1], [0], [0], [1], [0, 0, 1, 1], [], []>} : vector<64x64xf32>, vector<64x128xf32>, vector<64x128xf32> -> vector<64x128xf32>
    %c0_13 = arith.constant 0 : index
    %c0_14 = arith.constant 0 : index
    %16 = vector.load %arg7[%c0_13, %c0_14] : memref<64x1xf32, #tpu.memory_space<vmem>>, vector<64x1xf32>
    %17 = vector.broadcast %16 : vector<64x1xf32> to vector<64x128xf32>
    %18 = arith.addf %15, %17 : vector<64x128xf32>
    %cst_15 = arith.constant 0.000000e+00 : f32
    %19 = vector.broadcast %cst_15 : f32 to vector<64x128xf32>
    %20 = arith.maximumf %18, %19 : vector<64x128xf32>
    %c0_16 = arith.constant 0 : index
    %c0_17 = arith.constant 0 : index
    %21 = vector.load %arg8[%c0_16, %c0_17] : memref<1x64xf32, #tpu.memory_space<vmem>>, vector<1x64xf32>
    %cst_18 = arith.constant dense<0.000000e+00> : vector<1x128xf32>
    %22 = tpu.matmul %21, %20, %cst_18 {dimension_numbers = #tpu.dot_dimension_numbers<[1], [0], [0], [1], [0, 0, 1, 1], [], []>} : vector<1x64xf32>, vector<64x128xf32>, vector<1x128xf32> -> vector<1x128xf32>
    %c0_19 = arith.constant 0 : index
    %c0_20 = arith.constant 0 : index
    %23 = vector.load %arg9[%c0_19, %c0_20] : memref<1x1xf32, #tpu.memory_space<vmem>>, vector<1x1xf32>
    %24 = vector.broadcast %23 : vector<1x1xf32> to vector<1x128xf32>
    %25 = arith.addf %22, %24 : vector<1x128xf32>
    %c0_21 = arith.constant 0 : index
    %c0_22 = arith.constant 0 : index
    %26 = vector.load %arg10[%c0_21, %c0_22] : memref<1x128xf32, #tpu.memory_space<vmem>>, vector<1x128xf32>
    tpu.vector_store %arg10[%c0_21, %c0_22], %25 {strides = array<i32>} : memref<1x128xf32, #tpu.memory_space<vmem>>, vector<1x128xf32>,
    return
  }
  func.func @transform_0(%arg0: i32) -> (i32, i32) {
    %c0_i32 = arith.constant 0 : i32
    %c0_i32_0 = arith.constant 0 : i32
    return %c0_i32, %arg0 : i32, i32
  }
  func.func @transform_1(%arg0: i32) -> (i32, i32) {
    %c0_i32 = arith.constant 0 : i32
    %c0_i32_0 = arith.constant 0 : i32
    return %c0_i32, %arg0 : i32, i32
  }
  func.func @transform_2(%arg0: i32) -> (i32, i32) {
    %c0_i32 = arith.constant 0 : i32
    %c0_i32_0 = arith.constant 0 : i32
    %c0_i32_1 = arith.constant 0 : i32
    return %c0_i32, %c0_i32_0 : i32, i32
  }
  func.func @transform_3(%arg0: i32) -> (i32, i32) {
    %c0_i32 = arith.constant 0 : i32
    %c0_i32_0 = arith.constant 0 : i32
    %c0_i32_1 = arith.constant 0 : i32
    return %c0_i32, %c0_i32_0 : i32, i32
  }
  func.func @transform_4(%arg0: i32) -> (i32, i32) {
    %c0_i32 = arith.constant 0 : i32
    %c0_i32_0 = arith.constant 0 : i32
    %c0_i32_1 = arith.constant 0 : i32
    return %c0_i32, %c0_i32_0 : i32, i32
  }
  func.func @transform_5(%arg0: i32) -> (i32, i32) {
    %c0_i32 = arith.constant 0 : i32
    %c0_i32_0 = arith.constant 0 : i32
    %c0_i32_1 = arith.constant 0 : i32
    return %c0_i32, %c0_i32_0 : i32, i32
  }
  func.func @transform_6(%arg0: i32) -> (i32, i32) {
    %c0_i32 = arith.constant 0 : i32
    %c0_i32_0 = arith.constant 0 : i32
    %c0_i32_1 = arith.constant 0 : i32
    return %c0_i32, %c0_i32_0 : i32, i32
  }
  func.func @transform_7(%arg0: i32) -> (i32, i32) {
    %c0_i32 = arith.constant 0 : i32
    %c0_i32_0 = arith.constant 0 : i32
    %c0_i32_1 = arith.constant 0 : i32
    return %c0_i32, %c0_i32_0 : i32, i32
  }
  func.func @transform_8(%arg0: i32) -> (i32, i32) {
    %c0_i32 = arith.constant 0 : i32
    %c0_i32_0 = arith.constant 0 : i32
    %c0_i32_1 = arith.constant 0 : i32
    return %c0_i32, %c0_i32_0 : i32, i32
  }
  func.func @transform_9(%arg0: i32) -> (i32, i32) {
    %c0_i32 = arith.constant 0 : i32
    %c0_i32_0 = arith.constant 0 : i32
    return %c0_i32, %arg0 : i32, i32
  }
}

</mosaic_0001>

<bundles_post_ra>
// kernel: tpu_custom_call.1
= control target key start
LH: loop header
LB: loop body
LE: loop exit
PB: predicated region body
PF: predicated region fallthrough
CT: control target
= control target key end

     0   :  { %s953_s0 = inlined_call_operand.vmem [shape: f32[15,128], index: 0, kind: input, shape index: {}]   ;;  %s954_s1 = inlined_call_operand.vmem [shape: f32[1,128], index: 1, kind: input, shape index: {}]   ;;  %s955_s2 = inlined_call_operand.vmem [shape: f32[64,15], index: 2, kind: input, shape index: {}]   ;;  %s956_s3 = inlined_call_operand.vmem [shape: f32[64,1], index: 3, kind: input, shape index: {}]   ;;  %s957_s4 = inlined_call_operand.vmem [shape: f32[64,1], index: 4, kind: input, shape index: {}]   ;;  %s958_s5 = inlined_call_operand.vmem [shape: f32[64,64], index: 5, kind: input, shape index: {}]   ;;  %s959_s6 = inlined_call_operand.vmem [shape: f32[64,1], index: 6, kind: input, shape index: {}]   ;;  %s960_s7 = inlined_call_operand.vmem [shape: f32[1,64], index: 7, kind: input, shape index: {}]   ;;  %s961_s8 = inlined_call_operand.<no memory space> [shape: f32[1,1], index: 8, kind: input, shape index: {}]   ;;  %s962_s9 = inlined_call_operand.hbm [shape: f32[1,128], index: 9, kind: output, shape index: {}]  }
   0x1   :  { %v14_v0 = vstv %s961_s8 }
   0x2   :  { %15 = vst [vmem:[#allocation2] sm:$0x1] %v14_v0 }
   0x3   :  { %v36_v1 = vld [vmem:[%s953_s0 + $0x8] sm:$0x7f]  ;;  %vm133_vm0 = vcmask 1046528   ;;  %v35_v2 = vld [vmem:[%s953_s0] sm:$0xff]  ;;  %vm108_vm1 = vcmask 121856   ;;  %v744_v5 = vmov 0  }
   0x4   :  { %v38_v3 = vld [vmem:[%s955_s2] sm:$0xff]  ;;  %653 = vmatprep.subr.msk.mxu0 %vm133_vm0, %v36_v1  ;;  %v39_v4 = vld [vmem:[%s955_s2 + $0x8] sm:$0xff]  ;;  %720 = vset.pattern.permute.xlu0 %v744_v5  ;;  %v40_v6 = vld [vmem:[%s955_s2 + $0x10] sm:$0xff] }
   0x5   :  { %657 = vmatprep.mubr.msk.f32.mxu0 %vm108_vm1, %v38_v3  ;;  %654 = vmatpush3.msk.msra.mxu0 %vm133_vm0, %v36_v1  ;;  %v53_v7 = vld [vmem:[%s956_s3 + $0x38] sm:$0xff]  ;;  %v51_v8 = vld [vmem:[%s956_s3 + $0x28] sm:$0xff]  ;;  %v52_v9 = vld [vmem:[%s956_s3 + $0x30] sm:$0xff] }
   0x6   :  { %655 = vmatprep.subr.mxu0 %v35_v2  ;;  %721 = vset.pattern.permute.xlu1 %v744_v5  ;;  %v41_v10 = vld [vmem:[%s955_s2 + $0x18] sm:$0xff]  ;;  %v42_v12 = vld [vmem:[%s955_s2 + $0x20] sm:$0xff]  ;;  %v43_v14 = vld [vmem:[%s955_s2 + $0x28] sm:$0xff] }
   0x7   :  { %656 = vmatpush3.msra.mxu0 %v35_v2  ;;  %91 = vperm.xlu0 %720, %v53_v7   ;;  %v249_v11 = vld [vmem:[%s957_s4 + $0x38] sm:$0xff]  ;;  %v50_v13 = vld [vmem:[%s956_s3 + $0x20] sm:$0xff]  ;;  %v248_v15 = vld [vmem:[%s957_s4 + $0x30] sm:$0xff] }
   0x8   :  { %658 = vmatmul.mubr.msk.f32.vlgmr.msra.gmra.mxu0 %vm108_vm1, %v39_v4  ;;  %81 = vperm.xlu1 %721, %v51_v8   ;;  %v44_v16 = vld [vmem:[%s955_s2 + $0x30] sm:$0xff] }
   0x9   :  { %660 = vmatprep.mubr.msk.f32.mxu0 %vm108_vm1, %v40_v6 }
   0xb   :  { %86 = vperm.xlu0 %720, %v52_v9  }
   0xc   :  { %661 = vmatmul.mubr.msk.f32.gmra.mxu0 %vm108_vm1, %v41_v10  ;;  %287 = vperm.xlu1 %721, %v249_v11  }
   0xd   :  { %663 = vmatprep.mubr.msk.f32.mxu0 %vm108_vm1, %v42_v12 }
   0xf   :  { %76 = vperm.xlu0 %720, %v50_v13  }
  0x10   :  { %16 = vsyncpa [#allocation4], 0  ;;  %664 = vmatmul.mubr.msk.f32.gmra.mxu0 %vm108_vm1, %v43_v14  ;;  %v49_v17 = vld [vmem:[%s956_s3 + $0x18] sm:$0xff]  ;;  %282 = vperm.xlu1 %721, %v248_v15   ;;  %v247_v19 = vld [vmem:[%s957_s4 + $0x28] sm:$0xff]  ;;  %vm362_vm2 = vcmask 523264   ;;  %vm746_vm3 = vmmov 0  }
  0x11   :  { %666 = vmatprep.mubr.msk.f32.mxu0 %vm108_vm1, %v44_v16  ;;  %v45_v18 = vld [vmem:[%s955_s2 + $0x38] sm:$0xff]  ;;  %v48_v20 = vld [vmem:[%s956_s3 + $0x10] sm:$0xff]  ;;  %v246_v21 = vld [vmem:[%s957_s4 + $0x20] sm:$0xff]  ;;  %s747_s20 = smov [#allocation3]  }
  0x12   :  { %v47_v22 = vld [vmem:[%s956_s3 + $0x8] sm:$0xff]  ;;  %v245_v23 = vld [vmem:[%s957_s4 + $0x18] sm:$0xff]  ;;  %v46_v24 = vld [vmem:[%s956_s3] sm:$0xff] }
  0x13   :  { %71 = vperm.xlu0 %720, %v49_v17   ;;  %v244_v25 = vld [vmem:[%s957_s4 + $0x10] sm:$0xff]  ;;  %v243_v26 = vld [vmem:[%s957_s4 + $0x8] sm:$0xff]  ;;  %v242_v27 = vld [vmem:[%s957_s4] sm:$0xff]  ;;  %s591_s4 = sshll.u32 %s747_s20, 4  ;;  %s592_s4 = int_to_ptr.vmem [resolvable:$true] %s591_s4 }
  0x14   :  { %667 = vmatmul.mubr.msk.f32.gmra.mxu0 %vm108_vm1, %v45_v18  ;;  %277 = vperm.xlu1 %721, %v247_v19   ;;  %v321_v28 = vld [vmem:[%s959_s6 + $0x38] sm:$0xff]  ;;  %v320_v29 = vld [vmem:[%s959_s6 + $0x30] sm:$0xff]  ;;  %v319_v30 = vld [vmem:[%s959_s6 + $0x28] sm:$0xff]  ;;  %s722_s21 = scalar_lea.vmem %s592_s4, 16  ;;  %s726_s22 = scalar_lea.vmem %s592_s4, 32 }
  0x15   :  { %v318_v31 = vld [vmem:[%s959_s6 + $0x20] sm:$0xff]  ;;  %v317_v32 = vld [vmem:[%s959_s6 + $0x18] sm:$0xff]  ;;  %v316_v33 = vld [vmem:[%s959_s6 + $0x10] sm:$0xff]  ;;  %p723_p0 = scmp.ne.s32.totalorder %s592_s4, %s722_s21  ;;  %p727_p1 = scmp.lt.s32.totalorder %s592_s4, %s592_s4 }
  0x16   :  { %v315_v34 = vld [vmem:[%s959_s6 + $0x8] sm:$0xff]  ;;  %v314_v35 = vld [vmem:[%s959_s6] sm:$0xff]  ;;  %p728_p2 = scmp.lt.s32.totalorder %s726_s22, %s722_s21 }
  0x17   :  { %66 = vperm.xlu0 %720, %v48_v20   ;;  %v501_v36 = vld [vmem:[#allocation2] sm:$0x1] }
  0x18   :  { %272 = vperm.xlu1 %721, %v246_v21   ;;  %v306_v37 = vld [vmem:[%s958_s5] sm:$0xff]  ;;  %p729_p3 = por %p728_p2, %p727_p1 }
  0x19   :  { %685 = vmatprep.mubr.msk.f32.mxu1 %vm362_vm2, %v306_v37  ;;  %v599_v51 = vld [vmem:[%s954_s1] ss:$0 sm:$0xff]  ;;  %v313_v37 = vld [vmem:[%s958_s5 + $0x38] sm:$0xff] }
  0x1a   :  { %p730_p4 = pnand %p729_p3, %p723_p0 }
  0x1b   :  { %61 = vperm.xlu0 %720, %v47_v22  }
  0x1c   :  { %267 = vperm.xlu1 %721, %v245_v23  }
  0x1f   :  { %56 = vperm.xlu0 %720, %v46_v24  }
  0x20   :  { %262 = vperm.xlu1 %721, %v244_v25  }
  0x23   :  { %257 = vperm.xlu0 %720, %v243_v26  }
  0x24   :  { %252 = vperm.xlu1 %721, %v242_v27  }
  0x27   :  { %359 = vperm.xlu0 %720, %v321_v28  }
  0x28   :  { %354 = vperm.xlu1 %721, %v320_v29  }
  0x2b   :  { %349 = vperm.xlu0 %720, %v319_v30  }
  0x2c   :  { %344 = vperm.xlu1 %721, %v318_v31   ;;  %v307_v31 = vld [vmem:[%s958_s5 + $0x8] sm:$0xff] }
  0x2f   :  { %339 = vperm.xlu0 %720, %v317_v32   ;;  %v308_v32 = vld [vmem:[%s958_s5 + $0x10] sm:$0xff] }
  0x30   :  { %334 = vperm.xlu1 %721, %v316_v33   ;;  %v309_v33 = vld [vmem:[%s958_s5 + $0x18] sm:$0xff] }
  0x33   :  { %329 = vperm.xlu0 %720, %v315_v34   ;;  %v310_v34 = vld [vmem:[%s958_s5 + $0x20] sm:$0xff] }
  0x34   :  { %324 = vperm.xlu1 %721, %v314_v35   ;;  %v311_v35 = vld [vmem:[%s958_s5 + $0x28] sm:$0xff] }
  0x37   :  { %504 = vperm.xlu0 %720, %v501_v36   ;;  %v312_v36 = vld [vmem:[%s958_s5 + $0x30] sm:$0xff] }
  0x82   :  { %v92_v38 = vpop.permute.xlu0 %91 }
  0x83   :  { %v82_v39 = vpop.permute.xlu1 %81  ;;  %v107_v55 = vmul.f32 %v599_v51, %v92_v38  ;;  %v745_v38 = vmov 0.0  }
  0x84   :  { %v105_v56 = vmul.f32 %v599_v51, %v82_v39  ;;  %697 = vmatprep.subr.mxu0 %v745_v38  ;;  %713 = vmatprep.mubr.msk.f32.mxu0 %vm746_vm3, %v745_v38 }
  0x86   :  { %v87_v40 = vpop.permute.xlu0 %86 }
  0x87   :  { %v288_v41 = vpop.permute.xlu1 %287  ;;  %v106_v59 = vmul.f32 %v599_v51, %v87_v40 }
  0x8a   :  { %v77_v42 = vpop.permute.xlu0 %76 }
  0x8b   :  { %v283_v43 = vpop.permute.xlu1 %282  ;;  %v104_v60 = vmul.f32 %v599_v51, %v77_v42 }
  0x8e   :  { %v72_v44 = vpop.permute.xlu0 %71 }
  0x8f   :  { %v278_v46 = vpop.permute.xlu1 %277  ;;  %v103_v1 = vmul.f32 %v599_v51, %v72_v44 }
  0x92   :  { %v67_v49 = vpop.permute.xlu0 %66 }
  0x93   :  { %v273_v52 = vpop.permute.xlu1 %272  ;;  %v102_v5 = vmul.f32 %v599_v51, %v67_v49 }
  0x96   :  { %v62_v57 = vpop.permute.xlu0 %61 }
  0x97   :  { %v268_v63 = vpop.permute.xlu1 %267  ;;  %v101_v6 = vmul.f32 %v599_v51, %v62_v57 }
  0x9a   :  { %v57_v11 = vpop.permute.xlu0 %56 }
  0x9b   :  { %v263_v15 = vpop.permute.xlu1 %262  ;;  %v100_v16 = vmul.f32 %v599_v51, %v57_v11 }
  0x9e   :  { %v258_v23 = vpop.permute.xlu0 %257 }
  0x9f   :  { %v253_v26 = vpop.permute.xlu1 %252 }
  0xc8   :  { %v659_v45 = vpop.f32.mrf.mxu0 }
  0xc9   :  { %v209_v17 = vadd.f32 %v659_v45, %v101_v6 }
  0xca   :  { %v203_v47 = vpop.f32.mrf.mxu0 }
  0xcb   :  { %v204_v20 = vadd.f32 %v203_v47, %v100_v16  ;;  %v291_v24 = vadd.f32 %v258_v23, %v209_v17 }
  0xcc   :  { %v662_v48 = vpop.f32.mrf.mxu0 }
  0xcd   :  { %v219_v7 = vadd.f32 %v662_v48, %v103_v1  ;;  %v290_v27 = vadd.f32 %v253_v26, %v204_v20  ;;  %v299_v29 = vmax.f32 %v291_v24, 0.0 }
  0xce   :  { %v213_v50 = vpop.f32.mrf.mxu0 }
  0xcf   :  { %v214_v12 = vadd.f32 %v213_v50, %v102_v5  ;;  %v293_v18 = vadd.f32 %v268_v63, %v219_v7  ;;  %v298_v30 = vmax.f32 %v290_v27, 0.0  ;;  %v500_v7 = vld [vmem:[%s960_s7] sm:$0x1] }
  0xd0   :  { %v665_v53 = vpop.f32.mrf.mxu0 }
  0xd1   :  { %v229_v61 = vadd.f32 %v665_v53, %v105_v56  ;;  %v292_v21 = vadd.f32 %v263_v15, %v214_v12  ;;  %v301_v25 = vmax.f32 %v293_v18, 0.0 }
  0xd2   :  { %v223_v54 = vpop.f32.mrf.mxu0 }
  0xd3   :  { %v224_v2 = vadd.f32 %v223_v54, %v104_v60  ;;  %v295_v8 = vadd.f32 %v278_v46, %v229_v61  ;;  %v300_v28 = vmax.f32 %v292_v21, 0.0 }
  0xd4   :  { %v668_v58 = vpop.f32.mrf.mxu0 }
  0xd5   :  { %v239_v62 = vadd.f32 %v668_v58, %v107_v55  ;;  %v294_v13 = vadd.f32 %v273_v52, %v224_v2  ;;  %v303_v19 = vmax.f32 %v295_v8, 0.0  ;;  %v507_v8 = vlaneseq }
  0xd6   :  { %v233_v0 = vpop.f32.mrf.mxu0 }
  0xd7   :  { %v234_v3 = vadd.f32 %v233_v0, %v106_v59  ;;  %v297_v4 = vadd.f32 %v288_v41, %v239_v62  ;;  %v302_v22 = vmax.f32 %v294_v13, 0.0  ;;  %v360_v41 = vpop.permute.xlu0 %359 }
  0xd9   :  { %v296_v9 = vadd.f32 %v283_v43, %v234_v3  ;;  %v305_v10 = vmax.f32 %v297_v4, 0.0  ;;  %v355_v43 = vpop.permute.xlu1 %354 }
  0xdb   :  { %v304_v14 = vmax.f32 %v296_v9, 0.0  ;;  %669 = vmatprep.subr.mxu1 %v305_v10  ;;  %v350_v46 = vpop.permute.xlu0 %349  ;;  %v508_v9 = vshrl.u32 %v507_v8, 7 }
  0xdc   :  { %670 = vmatpush3.msra.mxu1 %v305_v10 }
  0xdd   :  { %671 = vmatprep.subr.mxu1 %v304_v14  ;;  %v345_v48 = vpop.permute.xlu1 %344  ;;  %v509_v10 = vsub.s32 0, %v508_v9 }
  0xde   :  { %672 = vmatpush3.msra.mxu1 %v304_v14 }
  0xdf   :  { %673 = vmatprep.subr.mxu1 %v303_v19  ;;  %v340_v55 = vpop.permute.xlu0 %339 }
  0xe0   :  { %674 = vmatpush3.msra.mxu1 %v303_v19 }
  0xe1   :  { %675 = vmatprep.subr.mxu1 %v302_v22  ;;  %v335_v58 = vpop.permute.xlu1 %334 }
  0xe2   :  { %676 = vmatpush3.msra.mxu1 %v302_v22 }
  0xe3   :  { %677 = vmatprep.subr.mxu1 %v301_v25  ;;  %v330_v63 = vpop.permute.xlu0 %329 }
  0xe4   :  { %678 = vmatpush3.msra.mxu1 %v301_v25 }
  0xe5   :  { %679 = vmatprep.subr.mxu1 %v300_v28  ;;  %v325_v2 = vpop.permute.xlu1 %324 }
  0xe6   :  { %680 = vmatpush3.msra.mxu1 %v300_v28 }
  0xe7   :  { %681 = vmatprep.subr.mxu1 %v299_v29  ;;  %v505_v11 = vpop.permute.xlu0 %504 }
  0xe8   :  { %682 = vmatpush3.msra.mxu1 %v299_v29  ;;  %v510_v12 = vrot.slane %v505_v11, %v509_v10 }
  0xe9   :  { %683 = vmatprep.subr.mxu1 %v298_v30 }
  0xea   :  { %684 = vmatpush3.msra.mxu1 %v298_v30 }
  0xeb   :  { %686 = vmatmul.mubr.msk.f32.vlgmr.msra.gmra.mxu1 %vm362_vm2, %v307_v31 }
  0xec   :  { %688 = vmatprep.mubr.msk.f32.mxu1 %vm362_vm2, %v308_v32 }
  0xef   :  { %689 = vmatmul.mubr.msk.f32.gmra.mxu1 %vm362_vm2, %v309_v33 }
  0xf0   :  { %691 = vmatprep.mubr.msk.f32.mxu1 %vm362_vm2, %v310_v34 }
  0xf3   :  { %692 = vmatmul.mubr.msk.f32.gmra.mxu1 %vm362_vm2, %v311_v35 }
  0xf4   :  { %694 = vmatprep.mubr.msk.f32.mxu1 %vm362_vm2, %v312_v36 }
  0xf7   :  { %695 = vmatmul.mubr.msk.f32.gmra.mxu1 %vm362_vm2, %v313_v37 }
 0x1ab   :  { %v687_v39 = vpop.f32.mrf.mxu1 }
 0x1ac   :  { %v459_v0 = vadd.f32 %v687_v39, %v330_v63 }
 0x1ad   :  { %v453_v40 = vpop.f32.mrf.mxu1 }
 0x1ae   :  { %v454_v3 = vadd.f32 %v453_v40, %v325_v2  ;;  %v493_v5 = vmax.f32 %v459_v0, 0.0 }
 0x1af   :  { %v690_v42 = vpop.f32.mrf.mxu1 }
 0x1b0   :  { %v469_v59 = vadd.f32 %v690_v42, %v340_v55  ;;  %v492_v6 = vmax.f32 %v454_v3, 0.0 }
 0x1b1   :  { %v463_v44 = vpop.f32.mrf.mxu1 }
 0x1b2   :  { %v464_v61 = vadd.f32 %v463_v44, %v335_v58  ;;  %v495_v1 = vmax.f32 %v469_v59, 0.0 }
 0x1b3   :  { %v693_v45 = vpop.f32.mrf.mxu1 }
 0x1b4   :  { %v479_v52 = vadd.f32 %v693_v45, %v350_v46  ;;  %v494_v4 = vmax.f32 %v464_v61, 0.0 }
 0x1b5   :  { %v473_v47 = vpop.f32.mrf.mxu1 }
 0x1b6   :  { %v474_v56 = vadd.f32 %v473_v47, %v345_v48  ;;  %v497_v60 = vmax.f32 %v479_v52, 0.0 }
 0x1b7   :  { %v696_v49 = vpop.f32.mrf.mxu1 }
 0x1b8   :  { %v489_v50 = vadd.f32 %v696_v49, %v360_v41  ;;  %v496_v62 = vmax.f32 %v474_v56, 0.0 }
 0x1b9   :  { %v483_v51 = vpop.f32.mrf.mxu1 }
 0x1ba   :  { %v499_v53 = vmax.f32 %v489_v50, 0.0  ;;  %v484_v54 = vadd.f32 %v483_v51, %v355_v43 }
 0x1bc   :  { %v498_v57 = vmax.f32 %v484_v54, 0.0  ;;  %698 = vmatpush3.msra.mxu0 %v499_v53 }
 0x1bd   :  { %699 = vmatprep.subr.mxu0 %v745_v38 }
 0x1be   :  { %700 = vmatpush3.msra.mxu0 %v498_v57 }
 0x1bf   :  { %701 = vmatprep.subr.mxu0 %v745_v38 }
 0x1c0   :  { %702 = vmatpush3.msra.mxu0 %v497_v60 }
 0x1c1   :  { %703 = vmatprep.subr.mxu0 %v745_v38 }
 0x1c2   :  { %704 = vmatpush3.msra.mxu0 %v496_v62 }
 0x1c3   :  { %705 = vmatprep.subr.mxu0 %v745_v38 }
 0x1c4   :  { %706 = vmatpush3.msra.mxu0 %v495_v1 }
 0x1c5   :  { %707 = vmatprep.subr.mxu0 %v745_v38 }
 0x1c6   :  { %708 = vmatpush3.msra.mxu0 %v494_v4 }
 0x1c7   :  { %709 = vmatprep.subr.mxu0 %v745_v38 }
 0x1c8   :  { %710 = vmatpush3.msra.mxu0 %v493_v5 }
 0x1c9   :  { %711 = vmatprep.subr.mxu0 %v745_v38 }
 0x1ca   :  { %712 = vmatpush3.msra.mxu0 %v492_v6 }
 0x1cb   :  { %714 = vmatmul.mubr.msk.f32.vlgmr.msra.gmra.mxu0 %vm362_vm2, %v500_v7 }
 0x28b   :  { %v580_v13 = vpop.f32.mrf.mxu0 }
 0x28c   :  { %v581_v14 = vadd.f32 %v580_v13, %v510_v12 }
 0x28d   :  { %v715_v15 = vpop.f32.mrf.mxu0 }
 0x28e   :  { %584 = vst [vmem:[#allocation3] sm:$0x1] %v581_v14 }
 0x28f   :  { %733 = shalt.err (!%p730_p4)
}
 0x290   :  { %594 = dma.vmem_to_hbm [thread:$0]  %s592_s4, 16, %s962_s9, [#allocation4]  }
 0x291   :  { %742 = dma.done.wait [#allocation4], 16  }
 0x292   :  { %743 = vsyncadd [#allocation4], 4294967280 }
 0x293   :  { %598 = vsyncpa [#allocation4], 1 }

</bundles_post_ra>
